<compile_context>
chip_gen: v7x
topology: tpu7x:2x2x1
jax: 0.10.0
libtpu: 0.0.40
codegen_flags: <defaults>
</compile_context>

<pallas_src>
import jax
import jax.numpy as jnp
from jax.experimental import pallas as pl
from jax.experimental.pallas import tpu as pltpu

LN_EPS = 1e-5


def _round_up(a, b):
    return (a + b - 1) // b * b


def _vmem_budget_bytes():
    """Per-generation scoped-VMEM budget (v7x has only 64 MiB physical VMEM)."""
    try:
        kind = jax.devices()[0].device_kind.lower()
    except Exception:
        kind = ""
    if "v7" in kind:
        return 48 * 1024 * 1024
    return 64 * 1024 * 1024


# ----------------------------- kernels -----------------------------

def _layernorm_f32(x, gamma, beta):
    # Two-pass moments (numerically safer than E[x^2] - mean^2).
    mean = jnp.mean(x, axis=-1, keepdims=True)
    centered = x - mean
    var = jnp.mean(centered * centered, axis=-1, keepdims=True)
    y = centered * jax.lax.rsqrt(var + LN_EPS)
    return y * gamma + beta


def prenorm_full_kernel(x_ref, gamma_ref, beta_ref, w_ref, bias_ref, o_ref):
    # 1-D grid over row tiles; the full (D, H) bf16 weight is grid-invariant
    # (fetched once, kept resident). LayerNorm computed once per row tile.
    x = x_ref[...].astype(jnp.float32)
    y = _layernorm_f32(x, gamma_ref[...].astype(jnp.float32),
                       beta_ref[...].astype(jnp.float32))
    out = jnp.dot(y.astype(jnp.bfloat16), w_ref[...],
                  preferred_element_type=jnp.float32)
    out = out + bias_ref[...].astype(jnp.float32)
    o_ref[...] = out.astype(o_ref.dtype)


def prenorm_tiled_kernel(x_ref, gamma_ref, beta_ref, w_ref, bias_ref, o_ref,
                         y_ref):
    # 2-D grid (row tiles i, hidden tiles j). LayerNorm is computed once per
    # row tile (j == 0), cached as bf16 in VMEM scratch, and reused for all j.
    @pl.when(pl.program_id(1) == 0)
    def _():
        x = x_ref[...].astype(jnp.float32)
        y = _layernorm_f32(x, gamma_ref[...].astype(jnp.float32),
                           beta_ref[...].astype(jnp.float32))
        y_ref[...] = y.astype(y_ref.dtype)

    out = jnp.dot(y_ref[...], w_ref[...], preferred_element_type=jnp.float32)
    out = out + bias_ref[...].astype(jnp.float32)
    o_ref[...] = out.astype(o_ref.dtype)


# ----------------------------- wrapper -----------------------------

def prepare_linear_params(w, bias):
    """One-time (init) prep: bf16 weight for the MXU, f32 bias.

    Doing the cast here rather than per forward call removes an un-hidden
    HBM read+write pass over the weight from every layer invocation.
    """
    return w.astype(jnp.bfloat16), bias.astype(jnp.float32)


def prenorm_forward(x, gamma, beta, w_bf16, bias, *, out_dtype=None,
                    row_tile=256, max_hidden_tile=2048, force_hidden_tile=None):
    """PreNorm forward: Linear(LayerNorm(x)).

    x: (B, N, D); gamma/beta: (D,); w_bf16: (D, H) pre-cast bf16; bias: (H,).
    Returns (B, N, H) in `out_dtype` (defaults to x.dtype).
    """
    B, N, D = x.shape
    Dw, H = w_bf16.shape
    assert Dw == D, "weight in-dim must match LayerNorm dim"
    R = B * N
    out_dtype = x.dtype if out_dtype is None else out_dtype
    x_bytes = jnp.dtype(x.dtype).itemsize
    out_bytes = jnp.dtype(out_dtype).itemsize

    # Row tile: multiple of the dtype's sublane packing (8 f32 / 16 bf16 /
    # 32 i8). Expose >= 2 row tiles so both v7x TensorCores get work even for
    # small-batch inference (negligible overhead on single-TC v5e/v6e).
    sub = max(8, 32 // x_bytes)
    TM = min(_round_up(row_tile, sub), _round_up(R, sub))
    if -(-R // TM) < 2 and R > sub:
        TM = max(sub, _round_up(-(-R // 2), sub))

    budget = _vmem_budget_bytes()

    def _fits(tn):
        w_b = 2 * D * tn * 2                  # bf16 weight (double-buffer bound)
        x_b = 2 * TM * D * x_bytes            # x tile, double-buffered
        o_b = 2 * TM * tn * out_bytes         # out tile, double-buffered
        tmp = 3 * TM * D * 4 + TM * D * 2     # LN temporaries + bf16 y cache
        misc = 2 * (2 * D * 4 + tn * 4)       # gamma / beta / bias
        return w_b + x_b + o_b + tmp + misc <= budget

    # Hidden tiling: grid-invariant full-H weight when it fits VMEM (typical
    # ViT FC layers), otherwise the largest 128-multiple slice that does.
    if force_hidden_tile is not None and force_hidden_tile < H:
        TN = _round_up(min(force_hidden_tile, H), 128)
    elif _fits(H):
        TN = H
    else:
        TN = 128
        for cand in (2048, 1024, 512, 256):
            if cand <= min(max_hidden_tile, _round_up(H, 128)) and _fits(cand):
                TN = cand
                break

    x2 = x.reshape(R, D)          # metadata-only reshape
    gamma2 = gamma.reshape(1, D)
    beta2 = beta.reshape(1, D)
    bias2 = bias.reshape(1, H)

    # No wrapper padding / cropping: pl.cdiv grids + Pallas edge-block masking
    # handle ragged row / hidden extents.
    if TN == H:
        grid = (pl.cdiv(R, TM),)
        in_specs = [
            pl.BlockSpec((TM, D), lambda i: (i, 0)),     # x row tile
            pl.BlockSpec((1, D), lambda i: (0, 0)),      # gamma (invariant)
            pl.BlockSpec((1, D), lambda i: (0, 0)),      # beta  (invariant)
            pl.BlockSpec((D, H), lambda i: (0, 0)),      # weight (invariant)
            pl.BlockSpec((1, H), lambda i: (0, 0)),      # bias   (invariant)
        ]
        out_specs = pl.BlockSpec((TM, H), lambda i: (i, 0))
        kernel = prenorm_full_kernel
        scratch_shapes = []
        dim_sem = ("parallel",)
    else:
        grid = (pl.cdiv(R, TM), pl.cdiv(H, TN))
        in_specs = [
            pl.BlockSpec((TM, D), lambda i, j: (i, 0)),  # x (invariant in j)
            pl.BlockSpec((1, D), lambda i, j: (0, 0)),
            pl.BlockSpec((1, D), lambda i, j: (0, 0)),
            pl.BlockSpec((D, TN), lambda i, j: (0, j)),  # weight slice
            pl.BlockSpec((1, TN), lambda i, j: (0, j)),  # bias slice
        ]
        out_specs = pl.BlockSpec((TM, TN), lambda i, j: (i, j))
        kernel = prenorm_tiled_kernel
        scratch_shapes = [pltpu.VMEM((TM, D), jnp.bfloat16)]  # cached LN(x)
        # j must run sequentially per row tile so the cached LN is reused.
        dim_sem = ("parallel", "arbitrary")

    out2 = pl.pallas_call(
        kernel,
        out_shape=jax.ShapeDtypeStruct((R, H), out_dtype),
        grid=grid,
        in_specs=in_specs,
        out_specs=out_specs,
        scratch_shapes=scratch_shapes,
        compiler_params=pltpu.CompilerParams(
            dimension_semantics=dim_sem,
            vmem_limit_bytes=budget,
        ),
    )(x2, gamma2, beta2, w_bf16, bias2)

    return out2.reshape(B, N, H)


# ----------------------------- reference & demo -----------------------------

def prenorm_reference(x, gamma, beta, w, bias):
    mean = jnp.mean(x, axis=-1, keepdims=True)
    var = jnp.mean((x - mean) ** 2, axis=-1, keepdims=True)
    y = (x - mean) / jnp.sqrt(var + LN_EPS) * gamma + beta
    return jnp.einsum("bnd,dh->bnh", y, w) + bias


if __name__ == "__main__":
    key = jax.random.PRNGKey(0)
    kx, kg, kb, kw, kbias, kx2, kw2, kbias2 = jax.random.split(key, 8)

    # --- Test 1: small ViT-like shapes; full-H (grid-invariant weight) path ---
    B, N, D, H = 2, 8, 32, 64
    x = jax.random.normal(kx, (B, N, D), dtype=jnp.float32)
    # nn.LayerNorm init would be ones/zeros; random values exercise the affine.
    gamma = 1.0 + 0.1 * jax.random.normal(kg, (D,), dtype=jnp.float32)
    beta = 0.1 * jax.random.normal(kb, (D,), dtype=jnp.float32)
    w = jax.random.normal(kw, (D, H), dtype=jnp.float32) / jnp.sqrt(D)
    bias = 0.1 * jax.random.normal(kbias, (H,), dtype=jnp.float32)

    w_bf16, bias_f32 = prepare_linear_params(w, bias)           # init-time prep
    out = jax.block_until_ready(
        prenorm_forward(x, gamma, beta, w_bf16, bias_f32))
    ref = prenorm_reference(x, gamma, beta, w, bias)
    assert out.shape == (B, N, H)
    # bf16 MXU operands -> looser tolerance than a pure-f32 matmul.
    assert jnp.allclose(out, ref, atol=5e-2, rtol=5e-2), "full-path mismatch"

    # --- Test 2: forced hidden tiling + ragged row count (exercises the LN
    #     VMEM cache, the "arbitrary" j axis, and edge-block masking) ---
    B2, N2, H2 = 2, 9, 256
    x2 = jax.random.normal(kx2, (B2, N2, D), dtype=jnp.float32)
    w2 = jax.random.normal(kw2, (D, H2), dtype=jnp.float32) / jnp.sqrt(D)
    bias2 = 0.1 * jax.random.normal(kbias2, (H2,), dtype=jnp.float32)
    w2_bf16, bias2_f32 = prepare_linear_params(w2, bias2)
    out2 = jax.block_until_ready(
        prenorm_forward(x2, gamma, beta, w2_bf16, bias2_f32,
                        force_hidden_tile=128))
    ref2 = prenorm_reference(x2, gamma, beta, w2, bias2)
    assert out2.shape == (B2, N2, H2)
    assert jnp.allclose(out2, ref2, atol=5e-2, rtol=5e-2), "tiled-path mismatch"

    print("KERNEL_OK")
</pallas_src>

<mosaic_0001>
module attributes {stable_mosaic.version = 11 : i64} {
  func.func @prenorm_full_kernel(%arg0: i32, %arg1: memref<8x32xf32, #tpu.memory_space<vmem>>, %arg2: memref<1x32xf32, #tpu.memory_space<vmem>>, %arg3: memref<1x32xf32, #tpu.memory_space<vmem>>, %arg4: memref<32x64xbf16, #tpu.memory_space<vmem>>, %arg5: memref<1x64xf32, #tpu.memory_space<vmem>>, %arg6: memref<8x64xf32, #tpu.memory_space<vmem>>) attributes {dimension_semantics = [#tpu.dimension_semantics<parallel>], iteration_bounds = array<i64: 2>, scalar_prefetch = 0 : i64, scratch_operands = 0 : i64, tpu.core_type = #tpu.core_type<tc>, window_params = [{transform_indices = @transform_0, window_bounds = array<i64: 8, 32>}, {pipeline_mode = #tpu.pipeline_mode<synchronous>, transform_indices = @transform_1, window_bounds = array<i64: 1, 32>}, {pipeline_mode = #tpu.pipeline_mode<synchronous>, transform_indices = @transform_2, window_bounds = array<i64: 1, 32>}, {pipeline_mode = #tpu.pipeline_mode<synchronous>, transform_indices = @transform_3, window_bounds = array<i64: 32, 64>}, {pipeline_mode = #tpu.pipeline_mode<synchronous>, transform_indices = @transform_4, window_bounds = array<i64: 1, 64>}, {transform_indices = @transform_5, window_bounds = array<i64: 8, 64>}]} {
    %c0 = arith.constant 0 : index
    %c0_0 = arith.constant 0 : index
    %0 = vector.load %arg1[%c0, %c0_0] : memref<8x32xf32, #tpu.memory_space<vmem>>, vector<8x32xf32>
    %c0_1 = arith.constant 0 : index
    %c0_2 = arith.constant 0 : index
    %1 = vector.load %arg2[%c0_1, %c0_2] : memref<1x32xf32, #tpu.memory_space<vmem>>, vector<1x32xf32>
    %c0_3 = arith.constant 0 : index
    %c0_4 = arith.constant 0 : index
    %2 = vector.load %arg3[%c0_3, %c0_4] : memref<1x32xf32, #tpu.memory_space<vmem>>, vector<1x32xf32>
    %cst = arith.constant dense<0.000000e+00> : vector<8xf32>
    %3 = vector.multi_reduction <add>, %0, %cst [1] : vector<8x32xf32> to vector<8xf32>
    %4 = vector.shape_cast %3 : vector<8xf32> to vector<8x1xf32>
    %cst_5 = arith.constant 3.200000e+01 : f32
    %5 = vector.broadcast %cst_5 : f32 to vector<8x1xf32>
    %6 = arith.divf %4, %5 : vector<8x1xf32>
    %7 = vector.broadcast %6 : vector<8x1xf32> to vector<8x32xf32>
    %8 = arith.subf %0, %7 : vector<8x32xf32>
    %9 = arith.mulf %8, %8 : vector<8x32xf32>
    %cst_6 = arith.constant dense<0.000000e+00> : vector<8xf32>
    %10 = vector.multi_reduction <add>, %9, %cst_6 [1] : vector<8x32xf32> to vector<8xf32>
    %11 = vector.shape_cast %10 : vector<8xf32> to vector<8x1xf32>
    %cst_7 = arith.constant 3.200000e+01 : f32
    %12 = vector.broadcast %cst_7 : f32 to vector<8x1xf32>
    %13 = arith.divf %11, %12 : vector<8x1xf32>
    %cst_8 = arith.constant 9.99999974E-6 : f32
    %14 = vector.broadcast %cst_8 : f32 to vector<8x1xf32>
    %15 = arith.addf %13, %14 : vector<8x1xf32>
    %16 = math.rsqrt %15 : vector<8x1xf32>
    %17 = vector.broadcast %16 : vector<8x1xf32> to vector<8x32xf32>
    %18 = arith.mulf %8, %17 : vector<8x32xf32>
    %19 = vector.broadcast %1 : vector<1x32xf32> to vector<8x32xf32>
    %20 = arith.mulf %18, %19 : vector<8x32xf32>
    %21 = vector.broadcast %2 : vector<1x32xf32> to vector<8x32xf32>
    %22 = arith.addf %20, %21 : vector<8x32xf32>
    %23 = arith.truncf %22 : vector<8x32xf32> to vector<8x32xbf16>
    %c0_9 = arith.constant 0 : index
    %c0_10 = arith.constant 0 : index
    %24 = vector.load %arg4[%c0_9, %c0_10] : memref<32x64xbf16, #tpu.memory_space<vmem>>, vector<32x64xbf16>
    %cst_11 = arith.constant dense<0.000000e+00> : vector<8x64xf32>
    %25 = tpu.matmul %23, %24, %cst_11 {dimension_numbers = #tpu.dot_dimension_numbers<[1], [0], [0], [1], [0, 0, 1, 1], [], []>} : vector<8x32xbf16>, vector<32x64xbf16>, vector<8x64xf32> -> vector<8x64xf32>
    %c0_12 = arith.constant 0 : index
    %c0_13 = arith.constant 0 : index
    %26 = vector.load %arg5[%c0_12, %c0_13] : memref<1x64xf32, #tpu.memory_space<vmem>>, vector<1x64xf32>
    %27 = vector.broadcast %26 : vector<1x64xf32> to vector<8x64xf32>
    %28 = arith.addf %25, %27 : vector<8x64xf32>
    %c0_14 = arith.constant 0 : index
    %c0_15 = arith.constant 0 : index
    %29 = vector.load %arg6[%c0_14, %c0_15] : memref<8x64xf32, #tpu.memory_space<vmem>>, vector<8x64xf32>
    tpu.vector_store %arg6[%c0_14, %c0_15], %28 {strides = array<i32>} : memref<8x64xf32, #tpu.memory_space<vmem>>, vector<8x64xf32>,
    return
  }
  func.func @transform_0(%arg0: i32) -> (i32, i32) {
    %c0_i32 = arith.constant 0 : i32
    %c0_i32_0 = arith.constant 0 : i32
    return %arg0, %c0_i32 : i32, i32
  }
  func.func @transform_1(%arg0: i32) -> (i32, i32) {
    %c0_i32 = arith.constant 0 : i32
    %c0_i32_0 = arith.constant 0 : i32
    %c0_i32_1 = arith.constant 0 : i32
    return %c0_i32, %c0_i32_0 : i32, i32
  }
  func.func @transform_2(%arg0: i32) -> (i32, i32) {
    %c0_i32 = arith.constant 0 : i32
    %c0_i32_0 = arith.constant 0 : i32
    %c0_i32_1 = arith.constant 0 : i32
    return %c0_i32, %c0_i32_0 : i32, i32
  }
  func.func @transform_3(%arg0: i32) -> (i32, i32) {
    %c0_i32 = arith.constant 0 : i32
    %c0_i32_0 = arith.constant 0 : i32
    %c0_i32_1 = arith.constant 0 : i32
    return %c0_i32, %c0_i32_0 : i32, i32
  }
  func.func @transform_4(%arg0: i32) -> (i32, i32) {
    %c0_i32 = arith.constant 0 : i32
    %c0_i32_0 = arith.constant 0 : i32
    %c0_i32_1 = arith.constant 0 : i32
    return %c0_i32, %c0_i32_0 : i32, i32
  }
  func.func @transform_5(%arg0: i32) -> (i32, i32) {
    %c0_i32 = arith.constant 0 : i32
    %c0_i32_0 = arith.constant 0 : i32
    return %arg0, %c0_i32 : i32, i32
  }
}

</mosaic_0001>

<bundles_post_ra>
// kernel: tpu_custom_call.1
= control target key start
LH: loop header
LB: loop body
LE: loop exit
PB: predicated region body
PF: predicated region fallthrough
CT: control target
= control target key end

     0   :  { %10 = vsyncpa [#allocation3], 0  ;;  %s1195_s0 = inlined_call_operand.hbm [shape: f32[16,32], index: 0, kind: input, shape index: {}]   ;;  %s1196_s1 = inlined_call_operand.hbm [shape: f32[1,32], index: 1, kind: input, shape index: {}]   ;;  %s1197_s2 = inlined_call_operand.hbm [shape: f32[1,32], index: 2, kind: input, shape index: {}]   ;;  %s1198_s3 = inlined_call_operand.hbm [shape: bf16[32,64], index: 3, kind: input, shape index: {}]   ;;  %s1199_s4 = inlined_call_operand.hbm [shape: f32[1,64], index: 4, kind: input, shape index: {}]   ;;  %s1200_s5 = inlined_call_operand.hbm [shape: f32[16,64], index: 5, kind: output, shape index: {}]  }
   0x1   :  { %12 = vsyncpa [#allocation3 + $0x1], 0 }
   0x2   :  { %13 = vsyncpa [#allocation6], 0 }
   0x3   :  { %14 = vsyncpa [#allocation9], 0 }
   0x4   :  { %15 = vsyncpa [#allocation4], 0 }
   0x5   :  { %17 = vsyncpa [#allocation4 + $0x1], 0  ;;  %s906_s18 = smov 0   ;;  %s908_s19 = smov 0  }
   0x6   :  { %s910_s20 = smov 0   ;;  %s912_s21 = smov 0  }
   0x7 LB: > { %s866_s22 = smov [#allocation5]   ;;  %s927_s24 = sadd.s32 4294967295, %s864_s21   ;;  %s864_s21 = sphi %s912_s21, %s1224_s21   ;;  %s860_s20 = sphi %s910_s20, %s1223_s20   ;;  %s856_s19 = sphi %s908_s19, %s1222_s19   ;;  %s852_s18 = sphi %s906_s18, %s1221_s18  }
   0x8   : > { %s177_s23 = sshll.u32 %s866_s22, 4  ;;  %p517_p0 = scmp.ge.s32.totalorder %s864_s21, 1  ;;  %s932_s23 = int_to_ptr.vmem [resolvable:$true] %s177_s23 }
   0x9   : > { %p1201_p1 = scmp.eq.s32.totalorder %s927_s24, 0  ;;  %p164_p2 = scmp.lt.s32.totalorder %s864_s21, 3 }
   0xa   : > { %s867_s26 = smov [#allocation8]   ;;  %s868_s29 = smov [#allocation7]  }
   0xb   : > { %p934_p3 = pnand %p517_p0, %p164_p2  ;;  %s198_s27 = sshll.u32 %s867_s26, 4  ;;  %s941_s27 = int_to_ptr.vmem [resolvable:$true] %s198_s27 }
   0xc   : > { %s188_s30 = sshll.u32 %s868_s29, 4  ;;  %s648_s8 = scalar_lea.hbm %s1196_s1, 16  ;;  %s949_s30 = int_to_ptr.vmem [resolvable:$true] %s188_s30 }
   0xd   : > { %s1204_s25 = scalar_select %p934_p3, 1, 0 }
   0xe   : > { %p573_p5 = pneg %p934_p3  ;;  %p649_p7 = scmp.ne.s32.totalorder %s1196_s1, %s648_s8 }
   0xf   : > { %p655_p11 = scmp.lt.u32.totalorder %s648_s8, %s1196_s1 }
  0x10   : > { %p945_p6 = pnand %p573_p5, %p1201_p1 }
  0x12   : > { %p959_p8 = pneg %p945_p6 }
  0x14   : > { %p651_p9 = pnand %p959_p8, %p649_p7 }
  0x16   : > { %p652_p10 = pneg %p651_p9 }
  0x18   : > { %p657_p12 = pnand %p655_p11, %p652_p10 }
  0x1a   : > { %660 = shalt.err (!%p657_p12)
}
  0x1b   : > { %s661_s14 = scalar_lea.vmem %s932_s23, 16  ;;  %s668_s15 = scalar_lea.vmem %s932_s23, 32 }
  0x1c   : > { %p662_p13 = scmp.ne.s32.totalorder %s932_s23, %s661_s14  ;;  %p669_p5 = scmp.lt.s32.totalorder %s932_s23, %s932_s23 }
  0x1d   : > { %p670_p7 = scmp.lt.s32.totalorder %s668_s15, %s661_s14 }
  0x1e   : > { %p664_p0 = pnand %p662_p13, %p959_p8 }
  0x1f   : > { %p671_p9 = por %p670_p7, %p669_p5 }
  0x20   : > { %p665_p2 = pneg %p664_p0 }
  0x22   : > { %p672_p4 = pnand %p671_p9, %p665_p2 }
  0x24   : > { %675 = shalt.err (!%p672_p4)
}
  0x25   : > { %576 = dma.hbm_to_vmem [thread:$0]  (!%p945_p6), %s1196_s1, 16, %s932_s23, [#allocation6]  }
  0x26   : > { %s676_s29 = scalar_lea.hbm %s1198_s3, 256 }
  0x27   : > { %p677_p10 = scmp.ne.s32.totalorder %s1198_s3, %s676_s29  ;;  %p683_p4 = scmp.lt.u32.totalorder %s676_s29, %s1198_s3 }
  0x29   : > { %p679_p11 = pnand %p677_p10, %p959_p8 }
  0x2b   : > { %p680_p12 = pneg %p679_p11 }
  0x2d   : > { %p685_p13 = pnand %p683_p4, %p680_p12 }
  0x2f   : > { %688 = shalt.err (!%p685_p13)
}
  0x30   : > { %s689_s23 = scalar_lea.vmem %s941_s27, 256  ;;  %p697_p7 = scmp.lt.s32.totalorder %s941_s27, %s941_s27 }
  0x31   : > { %p690_p0 = scmp.ne.s32.totalorder %s941_s27, %s689_s23  ;;  %p698_p9 = scmp.lt.s32.totalorder %s689_s23, %s689_s23 }
  0x33   : > { %p692_p2 = pnand %p690_p0, %p959_p8  ;;  %p699_p10 = por %p698_p9, %p697_p7 }
  0x35   : > { %p693_p5 = pneg %p692_p2 }
  0x37   : > { %p700_p11 = pnand %p699_p10, %p693_p5 }
  0x39   : > { %703 = shalt.err (!%p700_p11)
}
  0x3a   : > { %s869_s10 = smov 64   ;;  %s870_s12 = smov 4  }
  0x3b   : > { %582 = dma.hbm_to_vmem [thread:$0]  (!%p945_p6), %s1198_s3, 256, %s941_s27, [#allocation9], %s869_s10, %s869_s10, %s870_s12  }
  0x3c   : > { %s704_s17 = scalar_lea.hbm %s1197_s2, 16 }
  0x3d   : > { %p705_p12 = scmp.ne.s32.totalorder %s1197_s2, %s704_s17  ;;  %p711_p0 = scmp.lt.u32.totalorder %s704_s17, %s1197_s2 }
  0x3f   : > { %p707_p4 = pnand %p705_p12, %p959_p8 }
  0x41   : > { %p708_p13 = pneg %p707_p4 }
  0x43   : > { %p713_p2 = pnand %p711_p0, %p708_p13 }
  0x45   : > { %716 = shalt.err (!%p713_p2)
}
  0x46   : > { %s717_s27 = scalar_lea.vmem %s949_s30, 16  ;;  %s724_s7 = scalar_lea.vmem %s949_s30, 32 }
  0x47   : > { %p718_p5 = scmp.ne.s32.totalorder %s949_s30, %s717_s27  ;;  %p725_p10 = scmp.lt.s32.totalorder %s949_s30, %s949_s30 }
  0x48   : > { %p726_p11 = scmp.lt.s32.totalorder %s724_s7, %s717_s27 }
  0x49   : > { %p720_p7 = pnand %p718_p5, %p959_p8 }
  0x4a   : > { %p727_p12 = por %p726_p11, %p725_p10 }
  0x4b   : > { %p721_p9 = pneg %p720_p7 }
  0x4d   : > { %p728_p4 = pnand %p727_p12, %p721_p9 }
  0x4f   : > { %731 = shalt.err (!%p728_p4)
}
  0x50   : > { %579 = dma.hbm_to_vmem [thread:$0]  (!%p945_p6), %s1197_s2, 16, %s949_s30, [#allocation6]  }
  0x51   : > { %s871_s23 = smov [#allocation10]   ;;  %s732_s14 = scalar_lea.hbm %s1199_s4, 16 }
  0x52   : > { %s212_s10 = sshll.u32 %s871_s23, 4  ;;  %p733_p13 = scmp.ne.s32.totalorder %s1199_s4, %s732_s14  ;;  %s213_s10 = int_to_ptr.vmem [resolvable:$true] %s212_s10 }
  0x53   : > { %p739_p5 = scmp.lt.u32.totalorder %s732_s14, %s1199_s4 }
  0x54   : > { %p735_p0 = pnand %p733_p13, %p959_p8 }
  0x56   : > { %p736_p2 = pneg %p735_p0 }
  0x58   : > { %p741_p7 = pnand %p739_p5, %p736_p2 }
  0x5a   : > { %744 = shalt.err (!%p741_p7)
}
  0x5b   : > { %s745_s30 = scalar_lea.vmem %s213_s10, 16  ;;  %s752_s26 = scalar_lea.vmem %s213_s10, 32 }
  0x5c   : > { %p746_p9 = scmp.ne.s32.totalorder %s213_s10, %s745_s30  ;;  %p753_p12 = scmp.lt.s32.totalorder %s213_s10, %s213_s10 }
  0x5d   : > { %p754_p4 = scmp.lt.s32.totalorder %s752_s26, %s745_s30 }
  0x5e   : > { %p748_p10 = pnand %p746_p9, %p959_p8 }
  0x5f   : > { %p755_p1 = por %p754_p4, %p753_p12 }
  0x60   : > { %p749_p11 = pneg %p748_p10 }
  0x62   : > { %p756_p3 = pnand %p755_p1, %p749_p11 }
  0x64   : > { %759 = shalt.err (!%p756_p3)
}
  0x65   : > { %585 = dma.hbm_to_vmem [thread:$0]  (!%p945_p6), %s1199_s4, 16, %s213_s10, [#allocation9]  }
  0x66   : > { %s516_s11 = sadd.s32 4294967294, %s864_s21   ;;  %s1048_s28 = sadd.s32 1, %s864_s21  }
  0x67   : > { %s27_s27 = ssub.s32 %s864_s21, %s1048_s28  ;;  %s30_s7 = sadd.s32 1, %s860_s20 }
  0x68   : > { %p28_p1 = scmp.eq.s32.totalorder %s27_s27, 0  ;;  %p37_p3 = scmp.ne.s32.totalorder %s860_s20, %s856_s19 }
  0x69   : > { %p38_p8 = scmp.eq.s32.totalorder %s864_s21, 0  ;;  %p43_p13 = scmp.ne.s32.totalorder %s856_s19, %s852_s18 }
  0x6a   : > { %s1059_s8 = scalar_select %p28_p1, %s860_s20, %s30_s7  }
  0x6b   : > { %p1061_p0 = por %p38_p8, %p37_p3  ;;  %p1208_p2 = scmp.eq.s32.totalorder %s927_s24, 0 }
  0x6c   : > { %p151_p5 = scmp.eq.s32.totalorder %s927_s24, 1  ;;  %p157_p7 = scmp.eq.s32.totalorder %s516_s11, 1 }
  0x6d   : > { %p1067_p6 = por %p1208_p2, %p43_p13  ;;  %p598_p9 = scmp.lt.s32.totalorder %s864_s21, 2 }
  0x6e   : > { %s223_s10 = sand.u32 1, %s860_s20   ;;  %p1074_p10 = por %p151_p5, %p37_p3 }
  0x6f   : > { %p1078_p11 = por %p157_p7, %p43_p13  ;;  %s523_s14 = sshll.u32 %s223_s10, 3 }
  0x70   : > { %s1210_s12 = scalar_select %p1074_p10, 1, 0 }
  0x71   : > { %s1211_s13 = scalar_select %p1078_p11, 1, 0 }
  0x72   : > { %s524_s15 = sshll.u32 %s864_s21, 7  ;;  %s227_s30 = scalar_lea.vmem [#allocation2], %s523_s14 }
  0x73   : > { %s1086_s22 = scalar_lea.hbm %s1195_s0, %s524_s15  ;;  %s234_s26 = sshll.u32 %s227_s30, 4  ;;  %s1088_s26 = int_to_ptr.vmem [resolvable:$true] %s234_s26 }
  0x74   : > { %p1092_p12 = pnand %p598_p9, %p1061_p0  ;;  %s224_s6 = scalar_lea.sflag [#allocation3], %s223_s10 }
  0x75   : > { %s760_s11 = scalar_lea.hbm %s1086_s22, 128  ;;  %s765_s14 = scalar_lea.hbm %s1195_s0, 256 }
  0x76   : > { %p761_p4 = scmp.ne.s32.totalorder %s1086_s22, %s760_s11  ;;  %p762_p1 = pneg %p1092_p12 }
  0x77   : > { %p766_p13 = scmp.lt.u32.totalorder %s1086_s22, %s1195_s0  ;;  %p767_p0 = scmp.lt.u32.totalorder %s765_s14, %s760_s11 }
  0x78   : > { %p763_p3 = pnand %p762_p1, %p761_p4  ;;  %p769_p5 = scmp.lt.u32.totalorder %s760_s11, %s1086_s22 }
  0x79   : > { %p768_p2 = por %p767_p0, %p766_p13 }
  0x7a   : > { %p764_p8 = pneg %p763_p3 }
  0x7b   : > { %p770_p7 = por %p769_p5, %p768_p2 }
  0x7d   : > { %p771_p9 = pnand %p770_p7, %p764_p8 }
  0x7f   : > { %774 = shalt.err (!%p771_p9)
}
  0x80   : > { %s775_s10 = scalar_lea.vmem %s1088_s26, 128  ;;  %s872_s16 = smov [#allocation2]  }
  0x81   : > { %p776_p4 = scmp.ne.s32.totalorder %s1088_s26, %s775_s10  ;;  %s780_s17 = sshll.u32 %s872_s16, 4  ;;  %s781_s17 = int_to_ptr.vmem [resolvable:$false] %s780_s17 }
  0x82   : > { %s782_s30 = scalar_lea.vmem %s781_s17, 256  ;;  %p783_p10 = scmp.lt.s32.totalorder %s1088_s26, %s781_s17 }
  0x83   : > { %p778_p3 = pnand %p776_p4, %p762_p1  ;;  %p784_p13 = scmp.lt.s32.totalorder %s782_s30, %s775_s10 }
  0x85   : > { %p779_p11 = pneg %p778_p3  ;;  %p785_p0 = por %p784_p13, %p783_p10 }
  0x87   : > { %p786_p2 = pnand %p785_p0, %p779_p11 }
  0x89   : > { %789 = shalt.err (!%p786_p2)
}
  0x8a   : > { %589 = dma.hbm_to_vmem [thread:$0]  (!%p1092_p12), %s1086_s22, 128, %s1088_s26, %s224_s6  }
  0x8b   : > { %p1213_p8 = scmp.ne.s32.totalorder %s1204_s25, 0 }
  0x8c   : > { %s1124_s11 = sand.u32 (!%p1213_p8), 1, %s856_s19  }
  0x8d   : > { %243 = sbr.rel (%p1213_p8) target bundleno = 699 (0x2bb), region = 40  ;;  %s526_s27 = sshll.u32 (!%p1213_p8), %s1124_s11, 3 }
  0x8e   : > { %s246_s7 = scalar_lea.sflag (!%p1213_p8), [#allocation3], %s1124_s11  ;;  %s249_s14 = scalar_lea.vmem (!%p1213_p8), [#allocation2], %s526_s27 }
  0x94   : > { %835 = dma.done.wait (%p1067_p6), %s246_s7, 128  }
  0x95   : > { %837 = vsyncadd (%p1067_p6), %s246_s7, 4294967168  ;;  %p1214_p10 = scmp.eq.s32.totalorder %s927_s24, 0 }
  0x97   : > { %839 = dma.done.wait (%p1214_p10), [#allocation6], 32   ;;  %p1215_p11 = pmov %p1214_p10 }
  0x98   : > { %p1216_p12 = pmov %p1214_p10 }
  0x99   : > { %841 = vsyncadd (%p1215_p11), [#allocation6], 4294967264 }
  0x9a   : > { %843 = dma.done.wait (%p1216_p12), [#allocation9], 272   ;;  %p1217_p1 = pmov %p1214_p10 }
  0x9b   : > { %vm296_vm0 = vcmask 261120   ;;  %v293_v0 = vld [vmem:[%s249_s14] sm:$0xff]  ;;  %v644_v7 = vld [vmem:[#allocation8] sm:$0xff]   ;;  %v873_v8 = vmov 0.0   ;;  %vm874_vm1 = vmmov 0   ;;  %s539_s25 = sshll.u32 %s927_s24, 7 }
  0x9c   : > { %845 = vsyncadd (%p1217_p1), [#allocation9], 4294967024  ;;  %v297_v1 = vsel %vm296_vm0, %v293_v0, 0.0  ;;  %545 = vmatprep.subr.bf16.mxu0 %v873_v8  ;;  %v645_v9 = vld [vmem:[#allocation8 + $0x8] sm:$0xff]   ;;  %549 = vmatprep.mubr.msk.bf16.mxu0 %vm874_vm1, %v873_v8  ;;  %v532_v14 = vld [vmem:[#allocation5] ss:$0 sm:$0xff]  ;;  %s1151_s6 = scalar_lea.hbm %s1200_s5, %s539_s25 }
  0x9d   : > { %298 = vadd.xlane.f32.xlu0 %v297_v1  ;;  %546 = vmatpush3.bf16.msra.mxu0 %v644_v7  ;;  %v533_v16 = vld [vmem:[#allocation7] ss:$0 sm:$0xff]  ;;  %v534_v20 = vld [vmem:[#allocation10] ss:$0 sm:$0xff]  ;;  %s291_s23 = scalar_lea.vmem [#allocation11], %s526_s27  ;;  %vm392_vm2 = vcmask 523264  }
  0x9e   : > { %547 = vmatprep.subr.bf16.mxu0 %v873_v8  ;;  %s408_s22 = sshll.u32 %s291_s23, 4  ;;  %s395_s24 = scalar_lea.sflag [#allocation4], %s1124_s11  ;;  %s1153_s22 = int_to_ptr.vmem [resolvable:$true] %s408_s22 }
  0x9f   : > { %s790_s9 = scalar_lea.vmem %s1153_s22, 128  ;;  %p1218_p5 = scmp.ne.s32.totalorder %s1210_s12, 0 }
  0xa0   : > { %p791_p6 = scmp.ne.s32.totalorder %s1153_s22, %s790_s9  ;;  %s875_s15 = smov [#allocation11]  }
  0xa1   : > { %548 = vmatpush3.bf16.msra.mxu0 %v645_v9  ;;  %s794_s10 = sshll.u32 %s875_s15, 4  ;;  %s795_s10 = int_to_ptr.vmem [resolvable:$false] %s794_s10 }
  0xa2   : > { %p792_p7 = pnand %p791_p6, %p1218_p5  ;;  %s796_s16 = scalar_lea.vmem %s795_s10, 256 }
  0xa3   : > { %p797_p4 = scmp.lt.s32.totalorder %s1153_s22, %s795_s10  ;;  %p798_p3 = scmp.lt.s32.totalorder %s796_s16, %s790_s9 }
  0xa4   : > { %p793_p9 = pneg %p792_p7 }
  0xa5   : > { %p799_p13 = por %p798_p3, %p797_p4 }
  0xa7   : > { %p800_p0 = pnand %p799_p13, %p793_p9 }
 0x12a   : > { %v299_v2 = vpop.xlane.xlu0 %298 }
 0x12b   : > { %v301_v3 = vmul.f32 0.03125, %v299_v2 }
 0x12d   : > { %v302_v4 = vsub.f32 %v293_v0, %v301_v3 }
 0x12f   : > { %v303_v5 = vmul.f32 %v302_v4, %v302_v4 }
 0x131   : > { %v304_v6 = vsel %vm296_vm0, %v303_v5, 0.0 }
 0x132   : > { %305 = vadd.xlane.f32.xlu0 %v304_v6 }
 0x1bf   : > { %v306_v10 = vpop.xlane.xlu0 %305 }
 0x1c0   : > { %v307_v11 = vmul.f32 0.03125, %v306_v10 }
 0x1c2   : > { %v308_v12 = vadd.f32 1e-05, %v307_v11 }
 0x1c4   : > { %646 = vrsqrt.f32 %v308_v12 }
 0x1ce   : > { %v647_v13 = vpop.eup %646 }
 0x1cf   : > { %v310_v15 = vmul.f32 %v647_v13, %v302_v4 }
 0x1d1   : > { %v317_v17 = vmul.f32 %v532_v14, %v310_v15 }
 0x1d3   : > { %v324_v18 = vadd.f32 %v533_v16, %v317_v17 }
 0x1d5   : > { %v325_v19 = vpack.c.bf16 %v324_v18, %v324_v18 }
 0x1d7   : > { %550 = vmatmul.mubr.msk.bf16.vlgmr.msra.gmra.mrb[0].mxu0 %vm296_vm0, %v325_v19 }
 0x2aa   : > { %v386_v21 = vpop.f32.mrb[0].mxu0 }
 0x2ab   : > { %v387_v22 = vadd.f32 %v534_v20, %v386_v21  ;;  %v551_v23 = vpop.f32.mrb[1].mxu0 }
 0x2ac   : > { %v389_v24 = vpop.f32.mrb[2].mxu0 }
 0x2ad   : > { %v552_v25 = vpop.f32.mrb[3].mxu0  ;;  %393 = vst.msk [vmem:[%s291_s23] sm:$0xff] %vm392_vm2, %v387_v22 }
 0x2ae   : > { %803 = shalt.err (!%p800_p0)
}
 0x2af   : > { %s804_s17 = scalar_lea.hbm %s1151_s6, 128  ;;  %s808_s27 = scalar_lea.hbm %s1200_s5, 256 }
 0x2b0   : > { %p805_p2 = scmp.ne.s32.totalorder %s1151_s6, %s804_s17  ;;  %p809_p11 = scmp.lt.u32.totalorder %s1151_s6, %s1200_s5 }
 0x2b1   : > { %p810_p12 = scmp.lt.u32.totalorder %s808_s27, %s804_s17  ;;  %p812_p6 = scmp.lt.u32.totalorder %s804_s17, %s1151_s6 }
 0x2b2   : > { %p806_p8 = pnand %p805_p2, %p1218_p5 }
 0x2b3   : > { %p811_p1 = por %p810_p12, %p809_p11 }
 0x2b4   : > { %p807_p10 = pneg %p806_p8 }
 0x2b5   : > { %p813_p7 = por %p812_p6, %p811_p1 }
 0x2b7   : > { %p814_p9 = pnand %p813_p7, %p807_p10 }
 0x2b9   : > { %817 = shalt.err (!%p814_p9)
}
 0x2ba   : > { %571 = dma.vmem_to_hbm [thread:$0]  (%p1218_p5), %s1153_s22, 128, %s1151_s6, %s395_s24  }
 0x2bb PF: > { %s420_s25 = sand.u32 1, %s852_s18   ;;  %p1219_p4 = scmp.ne.s32.totalorder %s1211_s13, 0 }
 0x2bc   : > { %p1220_p3 = scmp.ge.s32.totalorder %s864_s21, 2  ;;  %s421_s23 = scalar_lea.sflag [#allocation4], %s420_s25 }
 0x2be   : > { %p591_p13 = pnand %p1220_p3, %p1219_p4 }
 0x2c0   : > { %847 = dma.done.wait (!%p591_p13), %s421_s23, 128  }
 0x2c1   : > { %849 = vsyncadd (!%p591_p13), %s421_s23, 4294967168  ;;  %p20_p0 = scmp.ge.s32.totalorder %s1048_s28, 4   ;;  %s1221_s18 = smov %s856_s19 }
 0x2c2   : > { %s1222_s19 = smov %s860_s20  ;;  %s1223_s20 = smov %s1059_s8 }
 0x2c3   : > { %s1224_s21 = smov %s1048_s28  ;;  %22 = sbr.rel (!%p20_p0) target bundleno = 7 (0x7), region = 101 }
 0x2ca   :  { %426 = vsyncpa [#allocation3], 1 }
 0x2cb   :  { %428 = vsyncpa [#allocation3 + $0x1], 1 }
 0x2cc   :  { %429 = vsyncpa [#allocation6], 1 }
 0x2cd   :  { %430 = vsyncpa [#allocation9], 1 }
 0x2ce   :  { %431 = vsyncpa [#allocation4], 1 }
 0x2cf   :  { %433 = vsyncpa [#allocation4 + $0x1], 1 }

</bundles_post_ra>
